<compile_context>
chip_gen: v7x
topology: tpu7x:2x2x1
jax: 0.10.0
libtpu: 0.0.40
codegen_flags: <defaults>
</compile_context>

<pallas_src>
import jax
import jax.numpy as jnp
from jax.experimental import pallas as pl
from jax.experimental.pallas import tpu as pltpu


def _coef_kernel(w_ref, b_ref, x_ref, xf_ref, xb_ref, xw_ref):
    # w_ref: (C_out, C_in)   b_ref: (C_out, 1)   x_ref: (C_in, TILE)
    # xf/xb/xw_ref: (1, TILE)   -- lane-dense spatial axis.
    y = jnp.dot(w_ref[...], x_ref[...], preferred_element_type=jnp.float32)
    y = (y + b_ref[...]).astype(xf_ref.dtype)
    xf_ref[...] = y[0:1, :]
    xb_ref[...] = y[1:2, :]
    xw_ref[...] = y[2:3, :]


def _pad_to(n, m):
    return ((n + m - 1) // m) * m


def _select_tile_and_vmem(hw, n_batch, c_in, in_itemsize, out_itemsize, tile_hw):
    """Pick a lane-dense spatial tile and a padding-aware scoped-VMEM limit."""
    # Double-buffered VMEM bytes consumed per lane of spatial tile:
    #   input block : C_in padded to 8 sublanes,
    #   3 outputs   : each (1, tile) padded to 8 sublanes.
    per_lane = 2 * (_pad_to(c_in, 8) * in_itemsize + 3 * 8 * out_itemsize)

    # Physical VMEM of this chip (v5e/v6e: 128 MiB, v7x: 64 MiB).
    try:
        phys_vmem = int(pltpu.get_tpu_info().vmem_capacity_bytes)
    except Exception:
        phys_vmem = 64 << 20  # conservative fallback (v7x-sized)
    budget = int(phys_vmem * 0.6)  # headroom for compiler scratch / semaphores

    # Per-generation lane target (all multiples of 128):
    #   v6e (1.4 TB/s HBM, 128 MiB VMEM): 128K lanes -> step overhead < ~12%.
    #   v5e (0.82 TB/s) and v7x (3.2 TB/s, 64 MiB VMEM): 64K is enough.
    try:
        kind = jax.devices()[0].device_kind.lower()
    except Exception:
        kind = ""
    target_lanes = (128 * 1024) if "v6" in kind else (64 * 1024)

    if tile_hw is None:
        tile_hw = target_lanes
    else:
        assert tile_hw % 128 == 0, "tile_hw must be a multiple of 128"

    max_from_vmem = max(128, (budget // per_lane) // 128 * 128)
    tile = min(tile_hw, max_from_vmem)

    if hw <= tile:
        tile = hw
        grid_hw = 1
        # v7x megacore: with a single image, split the spatial axis so both
        # TensorCores get a block (grid would otherwise collapse to (1, 1)).
        if n_batch == 1 and hw >= 256:
            tile = _pad_to((hw + 1) // 2, 128)
            grid_hw = pl.cdiv(hw, tile)
    else:
        grid_hw = pl.cdiv(hw, tile)

    # Explicit scoped-VMEM limit sized from the padded, double-buffered tile
    # footprint (the 16/32 MiB defaults would OOM for large tiles).
    footprint = per_lane * tile + (1 << 20)  # +1 MiB for weight/bias/misc
    vmem_limit = int(min(phys_vmem - (4 << 20),
                         max(32 << 20, int(footprint * 1.3))))
    return tile, grid_hw, vmem_limit


def coef_forward(x_nchw, weight, bias, *, tile_hw=None):
    """Forward pass of BP-Net `Coef` (1x1 conv -> split into 3 channels).

    x_nchw: (N, C_in, H, W)
    weight: (C_out=3, C_in)   -- PyTorch Conv2d weight (3, C_in, 1, 1) squeezed.
    bias:   (C_out=3,)
    Returns (XF, XB, XW), each (N, 1, H, W).
    """
    N, C_in, H, W = x_nchw.shape
    C_out = weight.shape[0]
    HW = H * W

    # Keep NCHW; flattening the spatial dims is a free (contiguous) reshape.
    x = x_nchw.reshape(N, C_in, HW)
    bias2d = bias.reshape(C_out, 1)

    out_dtype = x_nchw.dtype
    tile, grid_hw, vmem_limit = _select_tile_and_vmem(
        HW, N, C_in, x_nchw.dtype.itemsize, out_dtype.itemsize, tile_hw
    )
    grid = (N, grid_hw)

    out_shape = tuple(
        jax.ShapeDtypeStruct((N, 1, HW), out_dtype) for _ in range(3)
    )
    out_spec = pl.BlockSpec((None, 1, tile), lambda n, t: (n, 0, t))

    flops = 2 * N * HW * C_in * C_out
    bytes_accessed = (
        N * C_in * HW * x_nchw.dtype.itemsize
        + C_out * N * HW * out_dtype.itemsize
        + weight.size * weight.dtype.itemsize
        + bias.size * bias.dtype.itemsize
    )

    outs = pl.pallas_call(
        _coef_kernel,
        out_shape=out_shape,
        grid_spec=pltpu.PrefetchScalarGridSpec(
            num_scalar_prefetch=0,
            grid=grid,
            in_specs=[
                # Tiny, VMEM-resident (constant index map -> DMA'd once).
                pl.BlockSpec((C_out, C_in), lambda n, t: (0, 0)),
                pl.BlockSpec((C_out, 1), lambda n, t: (0, 0)),
                # Input block: channels in sublanes, spatial in lanes.
                pl.BlockSpec((None, C_in, tile), lambda n, t: (n, 0, t)),
            ],
            out_specs=[out_spec, out_spec, out_spec],
        ),
        compiler_params=pltpu.CompilerParams(
            dimension_semantics=("parallel", "parallel"),
            vmem_limit_bytes=vmem_limit,
        ),
        cost_estimate=pl.CostEstimate(
            flops=flops, transcendentals=0, bytes_accessed=bytes_accessed
        ),
    )(weight, bias2d, x)

    XF, XB, XW = (o.reshape(N, 1, H, W) for o in outs)
    return XF, XB, XW


if __name__ == "__main__":
    key = jax.random.PRNGKey(0)
    k_x, k_w, k_b, k_x2, k_w2 = jax.random.split(key, 5)

    C_out = 3

    # Case 1: small NCHW batch (default auto-selected tile covers all of HW).
    N, C_in, H, W = 2, 4, 16, 16
    x = jax.random.normal(k_x, (N, C_in, H, W), dtype=jnp.float32)
    weight = jax.random.normal(k_w, (C_out, C_in), dtype=jnp.float32) * 0.1
    bias = jax.random.normal(k_b, (C_out,), dtype=jnp.float32) * 0.1

    XF, XB, XW = coef_forward(x, weight, bias)
    jax.block_until_ready((XF, XB, XW))

    feat_ref = jnp.einsum("nchw,oc->nohw", x, weight) + bias[None, :, None, None]
    ref = (feat_ref[:, 0:1], feat_ref[:, 1:2], feat_ref[:, 2:3])
    for got, exp in zip((XF, XB, XW), ref):
        assert got.shape == (N, 1, H, W)
        assert jnp.allclose(got, exp, atol=1e-5), "mismatch vs reference (case 1)"

    # Case 2: single-image batch, spatial extent not divisible by the tile,
    # forced small tile to exercise the masked partial last block.
    N2, C2, H2, W2 = 1, 5, 12, 20
    x2 = jax.random.normal(k_x2, (N2, C2, H2, W2), dtype=jnp.float32)
    w2 = jax.random.normal(k_w2, (C_out, C2), dtype=jnp.float32) * 0.1

    XF2, XB2, XW2 = coef_forward(x2, w2, bias, tile_hw=128)
    jax.block_until_ready((XF2, XB2, XW2))

    feat2 = jnp.einsum("nchw,oc->nohw", x2, w2) + bias[None, :, None, None]
    for got, exp in zip((XF2, XB2, XW2),
                        (feat2[:, 0:1], feat2[:, 1:2], feat2[:, 2:3])):
        assert got.shape == (N2, 1, H2, W2)
        assert jnp.allclose(got, exp, atol=1e-5), "mismatch vs reference (case 2)"

    print("KERNEL_OK")
</pallas_src>

<mosaic_0001>
module attributes {stable_mosaic.version = 11 : i64} {
  func.func @_coef_kernel(%arg0: i32, %arg1: i32, %arg2: memref<3x4xf32, #tpu.memory_space<vmem>>, %arg3: memref<3x1xf32, #tpu.memory_space<vmem>>, %arg4: memref<1x4x256xf32, #tpu.memory_space<vmem>>, %arg5: memref<1x1x256xf32, #tpu.memory_space<vmem>>, %arg6: memref<1x1x256xf32, #tpu.memory_space<vmem>>, %arg7: memref<1x1x256xf32, #tpu.memory_space<vmem>>) attributes {dimension_semantics = [#tpu.dimension_semantics<parallel>, #tpu.dimension_semantics<parallel>], iteration_bounds = array<i64: 2, 1>, scalar_prefetch = 0 : i64, scratch_operands = 0 : i64, tpu.core_type = #tpu.core_type<tc>, window_params = [{pipeline_mode = #tpu.pipeline_mode<synchronous>, transform_indices = @transform_0, window_bounds = array<i64: 3, 4>}, {pipeline_mode = #tpu.pipeline_mode<synchronous>, transform_indices = @transform_1, window_bounds = array<i64: 3, 1>}, {transform_indices = @transform_2, window_bounds = array<i64: 1, 4, 256>}, {transform_indices = @transform_3, window_bounds = array<i64: 1, 1, 256>}, {transform_indices = @transform_4, window_bounds = array<i64: 1, 1, 256>}, {transform_indices = @transform_5, window_bounds = array<i64: 1, 1, 256>}]} {
    %c0 = arith.constant 0 : index
    %c0_0 = arith.constant 0 : index
    %0 = vector.load %arg2[%c0, %c0_0] : memref<3x4xf32, #tpu.memory_space<vmem>>, vector<3x4xf32>
    %c0_1 = arith.constant 0 : index
    %c0_2 = arith.constant 0 : index
    %c0_3 = arith.constant 0 : index
    %1 = vector.load %arg4[%c0_1, %c0_2, %c0_3] : memref<1x4x256xf32, #tpu.memory_space<vmem>>, vector<1x4x256xf32>
    %2 = vector.shape_cast %1 : vector<1x4x256xf32> to vector<4x256xf32>
    %cst = arith.constant dense<0.000000e+00> : vector<3x256xf32>
    %3 = tpu.matmul %0, %2, %cst {dimension_numbers = #tpu.dot_dimension_numbers<[1], [0], [0], [1], [0, 0, 1, 1], [], []>} : vector<3x4xf32>, vector<4x256xf32>, vector<3x256xf32> -> vector<3x256xf32>
    %c0_4 = arith.constant 0 : index
    %c0_5 = arith.constant 0 : index
    %4 = vector.load %arg3[%c0_4, %c0_5] : memref<3x1xf32, #tpu.memory_space<vmem>>, vector<3x1xf32>
    %5 = vector.broadcast %4 : vector<3x1xf32> to vector<3x256xf32>
    %6 = arith.addf %3, %5 : vector<3x256xf32>
    %7 = vector.extract_strided_slice %6 {offsets = [0, 0], sizes = [1, 256], strides = [1, 1]} : vector<3x256xf32> to vector<1x256xf32>
    %c0_6 = arith.constant 0 : index
    %c0_7 = arith.constant 0 : index
    %c0_8 = arith.constant 0 : index
    %8 = vector.load %arg5[%c0_6, %c0_7, %c0_8] : memref<1x1x256xf32, #tpu.memory_space<vmem>>, vector<1x1x256xf32>
    %9 = vector.shape_cast %8 : vector<1x1x256xf32> to vector<1x256xf32>
    %10 = vector.shape_cast %7 : vector<1x256xf32> to vector<1x1x256xf32>
    tpu.vector_store %arg5[%c0_6, %c0_7, %c0_8], %10 {strides = array<i32>} : memref<1x1x256xf32, #tpu.memory_space<vmem>>, vector<1x1x256xf32>,
    %11 = vector.extract_strided_slice %6 {offsets = [1, 0], sizes = [1, 256], strides = [1, 1]} : vector<3x256xf32> to vector<1x256xf32>
    %c0_9 = arith.constant 0 : index
    %c0_10 = arith.constant 0 : index
    %c0_11 = arith.constant 0 : index
    %12 = vector.load %arg6[%c0_9, %c0_10, %c0_11] : memref<1x1x256xf32, #tpu.memory_space<vmem>>, vector<1x1x256xf32>
    %13 = vector.shape_cast %12 : vector<1x1x256xf32> to vector<1x256xf32>
    %14 = vector.shape_cast %11 : vector<1x256xf32> to vector<1x1x256xf32>
    tpu.vector_store %arg6[%c0_9, %c0_10, %c0_11], %14 {strides = array<i32>} : memref<1x1x256xf32, #tpu.memory_space<vmem>>, vector<1x1x256xf32>,
    %15 = vector.extract_strided_slice %6 {offsets = [2, 0], sizes = [1, 256], strides = [1, 1]} : vector<3x256xf32> to vector<1x256xf32>
    %c0_12 = arith.constant 0 : index
    %c0_13 = arith.constant 0 : index
    %c0_14 = arith.constant 0 : index
    %16 = vector.load %arg7[%c0_12, %c0_13, %c0_14] : memref<1x1x256xf32, #tpu.memory_space<vmem>>, vector<1x1x256xf32>
    %17 = vector.shape_cast %16 : vector<1x1x256xf32> to vector<1x256xf32>
    %18 = vector.shape_cast %15 : vector<1x256xf32> to vector<1x1x256xf32>
    tpu.vector_store %arg7[%c0_12, %c0_13, %c0_14], %18 {strides = array<i32>} : memref<1x1x256xf32, #tpu.memory_space<vmem>>, vector<1x1x256xf32>,
    return
  }
  func.func @transform_0(%arg0: i32, %arg1: i32) -> (i32, i32) {
    %c0_i32 = arith.constant 0 : i32
    %c0_i32_0 = arith.constant 0 : i32
    %c0_i32_1 = arith.constant 0 : i32
    return %c0_i32, %c0_i32_0 : i32, i32
  }
  func.func @transform_1(%arg0: i32, %arg1: i32) -> (i32, i32) {
    %c0_i32 = arith.constant 0 : i32
    %c0_i32_0 = arith.constant 0 : i32
    %c0_i32_1 = arith.constant 0 : i32
    return %c0_i32, %c0_i32_0 : i32, i32
  }
  func.func @transform_2(%arg0: i32, %arg1: i32) -> (i32, i32, i32) {
    %c0_i32 = arith.constant 0 : i32
    %c0_i32_0 = arith.constant 0 : i32
    return %arg0, %c0_i32, %arg1 : i32, i32, i32
  }
  func.func @transform_3(%arg0: i32, %arg1: i32) -> (i32, i32, i32) {
    %c0_i32 = arith.constant 0 : i32
    %c0_i32_0 = arith.constant 0 : i32
    return %arg0, %c0_i32, %arg1 : i32, i32, i32
  }
  func.func @transform_4(%arg0: i32, %arg1: i32) -> (i32, i32, i32) {
    %c0_i32 = arith.constant 0 : i32
    %c0_i32_0 = arith.constant 0 : i32
    return %arg0, %c0_i32, %arg1 : i32, i32, i32
  }
  func.func @transform_5(%arg0: i32, %arg1: i32) -> (i32, i32, i32) {
    %c0_i32 = arith.constant 0 : i32
    %c0_i32_0 = arith.constant 0 : i32
    return %arg0, %c0_i32, %arg1 : i32, i32, i32
  }
}

</mosaic_0001>

<bundles_post_ra>
// kernel: tpu_custom_call.1
= control target key start
LH: loop header
LB: loop body
LE: loop exit
PB: predicated region body
PF: predicated region fallthrough
CT: control target
= control target key end

     0   :  { %s1212_s0 = inlined_call_operand.vmem [shape: f32[3,4], index: 0, kind: input, shape index: {}]   ;;  %s1213_s1 = inlined_call_operand.vmem [shape: f32[3,1], index: 1, kind: input, shape index: {}]   ;;  %s1214_s2 = inlined_call_operand.hbm [shape: f32[2,4,256], index: 2, kind: input, shape index: {}]   ;;  %s1215_s3 = inlined_call_operand.hbm [shape: f32[2,1,256], index: 3, kind: output, shape index: {0}]   ;;  %s1216_s4 = inlined_call_operand.hbm [shape: f32[2,1,256], index: 4, kind: output, shape index: {1}]   ;;  %s1217_s5 = inlined_call_operand.hbm [shape: f32[2,1,256], index: 5, kind: output, shape index: {2}]  }
   0x1   :  { %1222 = sst [smem:[#allocation12_spill]] %s1212_s0 }
   0x2   :  { %1223 = sst [smem:[#allocation13_spill]] %s1213_s1 }
   0x3   :  { %11 = vsyncpa [#allocation3], 0 }
   0x4   :  { %13 = vsyncpa [#allocation3 + $0x1], 0 }
   0x5   :  { %14 = vsyncpa [#allocation4], 0 }
   0x6   :  { %16 = vsyncpa [#allocation4 + $0x1], 0 }
   0x7   :  { %17 = vsyncpa [#allocation7], 0 }
   0x8   :  { %19 = vsyncpa [#allocation7 + $0x1], 0  ;;  %s939_s18 = smov 0   ;;  %s941_s19 = smov 0  }
   0x9   :  { %s943_s20 = smov 0   ;;  %s945_s21 = smov 0  }
   0xa   :  { %s947_s22 = smov 0   ;;  %s949_s23 = smov 0  }
   0xb LB: > { %s970_s24 = sadd.s32 4294967295, %s900_s23   ;;  %s1219_s25 = sadd.s32 4294967294, %s900_s23   ;;  %s900_s23 = sphi %s949_s23, %s25_s23   ;;  %s896_s22 = sphi %s947_s22, %s1246_s22   ;;  %s892_s21 = sphi %s945_s21, %s1245_s21   ;;  %s888_s20 = sphi %s943_s20, %s1244_s20   ;;  %s884_s19 = sphi %s941_s19, %s1243_s19   ;;  %s880_s18 = sphi %s939_s18, %s1242_s18  }
   0xc   : > { %s37_s26 = sadd.s32 1, %s896_s22  ;;  %s88_s27 = sadd.s32 1, %s888_s20 }
   0xd   : > { %p39_p0 = scmp.ge.s32.totalorder %s37_s26, 2  ;;  %p95_p1 = scmp.ne.s32.totalorder %s888_s20, %s884_s19 }
   0xe   : > { %p96_p2 = scmp.eq.s32.totalorder %s900_s23, 0  ;;  %p101_p3 = scmp.ne.s32.totalorder %s884_s19, %s880_s18 }
   0xf   : > { %s1248_s26 = smov (%p39_p0, %s37_s26), 0  ;;  %p102_p5 = scmp.eq.s32.totalorder %s970_s24, 0 }
  0x10   : > { %p982_p4 = por %p96_p2, %p95_p1  ;;  %s83_s29 = ssub.s32 %s896_s22, %s1248_s26 }
  0x11   : > { %p127_p6 = scmp.eq.s32.totalorder %s970_s24, 1  ;;  %p86_p7 = scmp.eq.s32.totalorder %s83_s29, 0 }
  0x12   : > { %p990_p8 = por %p102_p5, %p101_p3  ;;  %p133_p10 = scmp.eq.s32.totalorder %s1219_s25, 1 }
  0x13   : > { %p994_p9 = por %p127_p6, %p95_p1  ;;  %p673_p13 = scmp.lt.s32.totalorder %s900_s23, 2 }
  0x14   : > { %s1001_s7 = scalar_select %p86_p7, %s888_s20, %s88_s27  }
  0x15   : > { %s1226_s6 = scalar_select %p994_p9, 1, 0 }
  0x16   : > { %p1003_p11 = por %p133_p10, %p101_p3  ;;  %s215_s9 = sand.u32 1, %s888_s20  }
  0x17   : > { %s625_s10 = sshll.u32 %s215_s9, 3  ;;  %s647_s11 = sshll.u32 %s896_s22, 7 }
  0x18   : > { %s1227_s8 = scalar_select %p1003_p11, 1, 0 }
  0x19   : > { %s1014_s14 = scalar_lea.hbm %s1214_s2, %s647_s11  ;;  %s219_s15 = scalar_lea.vmem [#allocation2], %s625_s10 }
  0x1a   : > { %s229_s16 = sshll.u32 %s219_s15, 4  ;;  %p1020_p0 = pnand %p673_p13, %p982_p4  ;;  %s1016_s16 = int_to_ptr.vmem [resolvable:$true] %s229_s16 }
  0x1b   : > { %s216_s27 = scalar_lea.sflag [#allocation3], %s215_s9  ;;  %s728_s29 = scalar_lea.hbm %s1014_s14, 128 }
  0x1c   : > { %p729_p3 = scmp.ne.s32.totalorder %s1014_s14, %s728_s29  ;;  %p730_p5 = pneg %p1020_p0 }
  0x1d   : > { %s733_s28 = scalar_lea.hbm %s1214_s2, 256  ;;  %p734_p4 = scmp.lt.u32.totalorder %s1014_s14, %s1214_s2 }
  0x1e   : > { %p731_p6 = pnand %p730_p5, %p729_p3  ;;  %p735_p10 = scmp.lt.u32.totalorder %s733_s28, %s728_s29 }
  0x1f   : > { %p737_p12 = scmp.lt.u32.totalorder %s728_s29, %s1014_s14 }
  0x20   : > { %p732_p7 = pneg %p731_p6  ;;  %p736_p13 = por %p735_p10, %p734_p4 }
  0x22   : > { %p738_p1 = por %p737_p12, %p736_p13 }
  0x24   : > { %p739_p2 = pnand %p738_p1, %p732_p7 }
  0x26   : > { %742 = shalt.err (!%p739_p2)
}
  0x27   : > { %s743_s9 = scalar_lea.vmem %s1016_s16, 128  ;;  %s902_s15 = smov [#allocation2]  }
  0x28   : > { %p744_p3 = scmp.ne.s32.totalorder %s1016_s16, %s743_s9  ;;  %s748_s10 = sshll.u32 %s902_s15, 4  ;;  %s749_s10 = int_to_ptr.vmem [resolvable:$false] %s748_s10 }
  0x29   : > { %s750_s11 = scalar_lea.vmem %s749_s10, 256  ;;  %p751_p9 = scmp.lt.s32.totalorder %s1016_s16, %s749_s10 }
  0x2a   : > { %p746_p6 = pnand %p744_p3, %p730_p5  ;;  %p752_p4 = scmp.lt.s32.totalorder %s750_s11, %s743_s9 }
  0x2c   : > { %p747_p11 = pneg %p746_p6  ;;  %p753_p10 = por %p752_p4, %p751_p9 }
  0x2e   : > { %p754_p12 = pnand %p753_p10, %p747_p11 }
  0x30   : > { %757 = shalt.err (!%p754_p12)
}
  0x31   : > { %662 = dma.hbm_to_vmem [thread:$0]  (!%p1020_p0), %s1014_s14, 128, %s1016_s16, %s216_s27  }
  0x32   : > { %p1229_p1 = scmp.lt.s32.totalorder %s900_s23, 3  ;;  %p1230_p2 = scmp.ge.s32.totalorder %s900_s23, 1 }
  0x34   : > { %p235_p5 = pnand %p1230_p2, %p1229_p1 }
  0x35   : > { %s1056_s29 = sand.u32 (!%p235_p5), 1, %s884_s19  }
  0x36   : > { %238 = sbr.rel (%p235_p5) target bundleno = 352 (0x160), region = 32  ;;  %s629_s28 = sshll.u32 (!%p235_p5), %s1056_s29, 3 }
  0x37   : > { %s241_s12 = scalar_lea.sflag (!%p235_p5), [#allocation3], %s1056_s29  ;;  %s244_s13 = scalar_lea.vmem (!%p235_p5), [#allocation2], %s629_s28 }
  0x3d   : > { %867 = dma.done.wait (%p990_p8), %s241_s12, 128  }
  0x3e   : > { %869 = vsyncadd (%p990_p8), %s241_s12, 4294967168  ;;  %v903_v0 = vmov 0.0   ;;  %v904_v1 = vmov 0   ;;  %v286_v2 = vld [vmem:[%s244_s13] sm:$0xff]  ;;  %vm299_vm0 = vcmask 1043456   ;;  %s1231_s1 = sld [smem:[#allocation13_spill]]  ;;  %v381_v8 = vlaneseq }
  0x3f   : > { %368 = vmatprep.mubr.f32.mxu0 %v903_v0  ;;  %726 = vset.pattern.permute.xlu0 %v904_v1  ;;  %v294_v4 = vcombine.high %v286_v2, %v286_v2  ;;  %s1232_s0 = sld [smem:[#allocation12_spill]]  ;;  %vm295_vm1 = vcmask 31744   ;;  %v905_v6 = vmov 1966171168   ;;  %s1071_s30 = sshll.u32 %s1056_s29, 1 }
  0x40   : > { %v379_v7 = vunpack.c.l.s4 %v905_v6  ;;  %v382_v11 = vshrl.u32 %v381_v8, 7  ;;  %s648_s15 = sshll.u32 %s892_s21, 5  ;;  %s266_s10 = scalar_lea.vmem [#allocation5], %s1071_s30  ;;  %vm1079_vm2 = vcmp.lt.s32.totalorder %v381_v8, 256 }
  0x41   : > { %633 = vmatprep.subr.msk.mxu0 %vm299_vm0, %v294_v4  ;;  %s438_s11 = sshll.u32 %s266_s10, 4  ;;  %s1221_s28 = scalar_lea.vmem [#allocation6], %s1071_s30  ;;  %s1091_s11 = int_to_ptr.vmem [resolvable:$true] %s438_s11 }
  0x42   : > { %634 = vmatpush1.msk.msra.mxu0 %vm299_vm0, %v286_v2  ;;  %v380_v10 = vunpack.c.0.s8 %v379_v7  ;;  %s454_s12 = sshll.u32 %s1221_s28, 4  ;;  %s1220_s13 = scalar_lea.vmem [#allocation8], %s1071_s30  ;;  %s1098_s12 = int_to_ptr.vmem [resolvable:$true] %s454_s12 }
  0x43   : > { %s470_s14 = sshll.u32 %s1220_s13, 4  ;;  %s1089_s21 = scalar_lea.hbm %s1215_s3, %s648_s15  ;;  %s1107_s14 = int_to_ptr.vmem [resolvable:$true] %s470_s14 }
  0x44   : > { %v287_v3 = vld [vmem:[%s1231_s1] sm:$0x7]  ;;  %v383_v16 = vsub.s32 %v380_v10, %v382_v11  ;;  %s1096_s9 = scalar_lea.hbm %s1216_s4, %s648_s15  ;;  %s1105_s13 = scalar_lea.hbm %s1217_s5, %s648_s15 }
  0x45   : > { %290 = vperm.xlu0 %726, %v287_v3   ;;  %v285_v5 = vld [vmem:[%s1232_s0] sm:$0x7]  ;;  %s412_s25 = scalar_lea.sflag [#allocation4], %s1056_s29  ;;  %s758_s27 = scalar_lea.vmem %s1091_s11, 32 }
  0x46   : > { %635 = vmatmul.mubr.msk.f32.vlgmr.msra.gmra.mrb[0].mxu0 %vm295_vm1, %v285_v5  ;;  %p759_p8 = scmp.ne.s32.totalorder %s1091_s11, %s758_s27  ;;  %p1235_p9 = scmp.ne.s32.totalorder %s1226_s6, 0 }
  0x47   : > { %s906_s28 = smov [#allocation5]  }
  0x48   : > { %p760_p11 = pnand %p759_p8, %p1235_p9  ;;  %s762_s0 = sshll.u32 %s906_s28, 4  ;;  %s763_s0 = int_to_ptr.vmem [resolvable:$false] %s762_s0 }
  0x49   : > { %s764_s1 = scalar_lea.vmem %s763_s0, 64  ;;  %p765_p7 = scmp.lt.s32.totalorder %s1091_s11, %s763_s0 }
  0x4a   : > { %p761_p0 = pneg %p760_p11  ;;  %p766_p13 = scmp.lt.s32.totalorder %s764_s1, %s758_s27 }
  0x4c   : > { %p767_p3 = por %p766_p13, %p765_p7 }
  0x4e   : > { %p768_p6 = pnand %p767_p3, %p761_p0 }
  0xc4   : > { %v291_v9 = vpop.permute.xlu0 %290 }
 0x119   : > { %v370_v12 = vpop.f32.mrb[0].mxu0 }
 0x11a   : > { %v371_v13 = vadd.f32 %v370_v12, %v291_v9  ;;  %v372_v14 = vpop.f32.mrb[1].mxu0 }
 0x11b   : > { %v373_v15 = vadd.f32 %v372_v14, %v291_v9 }
 0x11d   : > { %v377_v17 = vcombine.low %v371_v13, %v373_v15 }
 0x11f   : > { %v384_v18 = vrot.slane %v377_v17, %v383_v16 }
 0x121   : > { %v391_v20 = vrot.slane %v384_v18, %v383_v16  ;;  %v398_v21 = vcombine.high %v384_v18, %v384_v18 }
 0x123   : > { %v405_v22 = vrot.slane %v398_v21, %v383_v16  ;;  %v408_v23 = vcombine.high %v391_v20, %v391_v20  ;;  %397 = vst.msk [vmem:[%s266_s10] sm:$0x3] %vm1079_vm2, %v391_v20 }
 0x124   : > { %771 = shalt.err (!%p768_p6)
}
 0x125   : > { %s772_s29 = scalar_lea.hbm %s1089_s21, 32  ;;  %s776_s28 = scalar_lea.hbm %s1215_s3, 64 }
 0x126   : > { %p773_p4 = scmp.ne.s32.totalorder %s1089_s21, %s772_s29  ;;  %p777_p1 = scmp.lt.u32.totalorder %s1089_s21, %s1215_s3 }
 0x127   : > { %p778_p2 = scmp.lt.u32.totalorder %s776_s28, %s772_s29  ;;  %p780_p8 = scmp.lt.u32.totalorder %s772_s29, %s1089_s21 }
 0x128   : > { %p774_p10 = pnand %p773_p4, %p1235_p9 }
 0x129   : > { %p779_p5 = por %p778_p2, %p777_p1 }
 0x12a   : > { %p775_p12 = pneg %p774_p10 }
 0x12b   : > { %p781_p11 = por %p780_p8, %p779_p5 }
 0x12d   : > { %p782_p0 = pnand %p781_p11, %p775_p12 }
 0x12f   : > { %785 = shalt.err (!%p782_p0)
}
 0x130   : > { %653 = dma.vmem_to_hbm [thread:$0]  (%p1235_p9), %s1091_s11, 32, %s1089_s21, %s412_s25  }
 0x131   : > { %s1236_s1 = scalar_lea.vmem [#allocation6], %s1071_s30  ;;  %s1237_s17 = scalar_lea.vmem [#allocation8], %s1071_s30 }
 0x132   : > { %407 = vst.msk [vmem:[%s1236_s1] sm:$0x3] %vm1079_vm2, %v405_v22  ;;  %410 = vst.msk [vmem:[%s1237_s17] sm:$0x3] %vm1079_vm2, %v408_v23  ;;  %s1238_s27 = sand.u32 1, %s970_s24   ;;  %s786_s15 = scalar_lea.vmem %s1098_s12, 32 }
 0x133   : > { %s1141_s29 = scalar_lea.sflag [#allocation7], %s1238_s27  ;;  %p787_p7 = scmp.ne.s32.totalorder %s1098_s12, %s786_s15 }
 0x134   : > { %s907_s10 = smov [#allocation6]  }
 0x135   : > { %p788_p13 = pnand %p787_p7, %p1235_p9  ;;  %s790_s28 = sshll.u32 %s907_s10, 4  ;;  %s791_s28 = int_to_ptr.vmem [resolvable:$false] %s790_s28 }
 0x136   : > { %s792_s11 = scalar_lea.vmem %s791_s28, 64  ;;  %p793_p6 = scmp.lt.s32.totalorder %s1098_s12, %s791_s28 }
 0x137   : > { %p789_p3 = pneg %p788_p13  ;;  %p794_p4 = scmp.lt.s32.totalorder %s792_s11, %s786_s15 }
 0x139   : > { %p795_p10 = por %p794_p4, %p793_p6 }
 0x13b   : > { %p796_p12 = pnand %p795_p10, %p789_p3 }
 0x13d   : > { %799 = shalt.err (!%p796_p12)
}
 0x13e   : > { %s800_s24 = scalar_lea.hbm %s1096_s9, 32  ;;  %s804_s25 = scalar_lea.hbm %s1216_s4, 64 }
 0x13f   : > { %p801_p1 = scmp.ne.s32.totalorder %s1096_s9, %s800_s24  ;;  %p805_p8 = scmp.lt.u32.totalorder %s1096_s9, %s1216_s4 }
 0x140   : > { %p806_p11 = scmp.lt.u32.totalorder %s804_s25, %s800_s24  ;;  %p808_p7 = scmp.lt.u32.totalorder %s800_s24, %s1096_s9 }
 0x141   : > { %p802_p2 = pnand %p801_p1, %p1235_p9 }
 0x142   : > { %p807_p0 = por %p806_p11, %p805_p8 }
 0x143   : > { %p803_p5 = pneg %p802_p2 }
 0x144   : > { %p809_p13 = por %p808_p7, %p807_p0 }
 0x146   : > { %p810_p3 = pnand %p809_p13, %p803_p5 }
 0x148   : > { %813 = shalt.err (!%p810_p3)
}
 0x149   : > { %654 = dma.vmem_to_hbm [thread:$0]  (%p1235_p9), %s1098_s12, 32, %s1096_s9, %s1141_s29  }
 0x14a   : > { %s814_s1 = scalar_lea.vmem %s1107_s14, 32  ;;  %s908_s17 = smov [#allocation8]  }
 0x14b   : > { %p815_p6 = scmp.ne.s32.totalorder %s1107_s14, %s814_s1  ;;  %s818_s27 = sshll.u32 %s908_s17, 4  ;;  %s819_s27 = int_to_ptr.vmem [resolvable:$false] %s818_s27 }
 0x14c   : > { %s820_s15 = scalar_lea.vmem %s819_s27, 64  ;;  %p821_p12 = scmp.lt.s32.totalorder %s1107_s14, %s819_s27 }
 0x14d   : > { %p816_p4 = pnand %p815_p6, %p1235_p9  ;;  %p822_p1 = scmp.lt.s32.totalorder %s820_s15, %s814_s1 }
 0x14f   : > { %p817_p10 = pneg %p816_p4  ;;  %p823_p2 = por %p822_p1, %p821_p12 }
 0x151   : > { %p824_p5 = pnand %p823_p2, %p817_p10 }
 0x153   : > { %827 = shalt.err (!%p824_p5)
}
 0x154   : > { %s828_s9 = scalar_lea.hbm %s1105_s13, 32  ;;  %s832_s28 = scalar_lea.hbm %s1217_s5, 64 }
 0x155   : > { %p829_p8 = scmp.ne.s32.totalorder %s1105_s13, %s828_s9  ;;  %p833_p7 = scmp.lt.u32.totalorder %s1105_s13, %s1217_s5 }
 0x156   : > { %p834_p13 = scmp.lt.u32.totalorder %s832_s28, %s828_s9  ;;  %p836_p6 = scmp.lt.u32.totalorder %s828_s9, %s1105_s13 }
 0x157   : > { %p830_p11 = pnand %p829_p8, %p1235_p9 }
 0x158   : > { %p835_p3 = por %p834_p13, %p833_p7 }
 0x159   : > { %p831_p0 = pneg %p830_p11 }
 0x15a   : > { %p837_p4 = por %p836_p6, %p835_p3 }
 0x15c   : > { %p838_p10 = pnand %p837_p4, %p831_p0 }
 0x15e   : > { %841 = shalt.err (!%p838_p10)
}
 0x15f   : > { %655 = dma.vmem_to_hbm [thread:$0]  (%p1235_p9), %s1107_s14, 32, %s1105_s13, %s1141_s29  }
 0x160 PF: > { %s482_s30 = sand.u32 1, %s880_s18   ;;  %p1239_p12 = scmp.ne.s32.totalorder %s1227_s8, 0 }
 0x161   : > { %p1240_p1 = scmp.ge.s32.totalorder %s900_s23, 2  ;;  %s483_s21 = scalar_lea.sflag [#allocation4], %s482_s30 }
 0x163   : > { %p664_p2 = pnand %p1240_p1, %p1239_p12 }
 0x165   : > { %871 = dma.done.wait (!%p664_p2), %s483_s21, 32  }
 0x166   : > { %873 = vsyncadd (!%p664_p2), %s483_s21, 4294967264  ;;  %s1241_s25 = sadd.s32 4294967294, %s900_s23  }
 0x167   : > { %s491_s16 = sand.u32 1, %s1241_s25  }
 0x168   : > { %s492_s0 = scalar_lea.sflag [#allocation7], %s491_s16 }
 0x169   : > { %875 = dma.done.wait (!%p664_p2), %s492_s0, 64  }
 0x16a   : > { %877 = vsyncadd (!%p664_p2), %s492_s0, 4294967232  ;;  %s25_s23 = sadd.s32 1, %s900_s23   ;;  %s1242_s18 = smov %s884_s19 }
 0x16b   : > { %p22_p9 = scmp.ge.s32.totalorder %s25_s23, 4   ;;  %s1243_s19 = smov %s888_s20 }
 0x16c   : > { %s1244_s20 = smov %s1001_s7  ;;  %s1245_s21 = smov %s896_s22 }
 0x16d   : > { %s1246_s22 = smov %s1248_s26  ;;  %24 = sbr.rel (!%p22_p9) target bundleno = 11 (0xb), region = 109 }
 0x174   :  { %506 = vsyncpa [#allocation3], 1 }
 0x175   :  { %508 = vsyncpa [#allocation3 + $0x1], 1 }
 0x176   :  { %509 = vsyncpa [#allocation4], 1 }
 0x177   :  { %511 = vsyncpa [#allocation4 + $0x1], 1 }
 0x178   :  { %512 = vsyncpa [#allocation7], 1 }
 0x179   :  { %514 = vsyncpa [#allocation7 + $0x1], 1 }

</bundles_post_ra>
